<compile_context>
chip_gen: v6e
topology: v6e:2x2x1
jax: 0.10.0
libtpu: 0.0.40
codegen_flags: <defaults>
</compile_context>

<pallas_src>
import functools
import math

import jax
import jax.numpy as jnp
from jax.experimental import pallas as pl
from jax.experimental.pallas import tpu as pltpu


def _round_up(x, m):
    return ((x + m - 1) // m) * m


def _round_down(x, m):
    return (x // m) * m


def _vmem_budget_and_limit():
    """Generation-aware VMEM budget (for tile sizing) and scoped limit."""
    try:
        cap = pltpu.get_tpu_info().vmem_capacity_bytes
    except Exception:
        # Fallback (interpret mode / unknown): assume the smallest (v7x 64 MiB/TC).
        cap = 64 * 1024 * 1024
    budget = int(cap * 0.375)   # v5e/v6e ~48 MiB, v7x ~24 MiB
    limit = int(cap * 0.65)     # v5e/v6e ~83 MiB, v7x ~41 MiB
    return budget, limit


def _layernorm_kernel(x_ref, a_ref, b_ref, o_ref, *, eps, features):
    x = x_ref[...].astype(jnp.float32)                        # (T, F)
    mean = jnp.mean(x, axis=-1, keepdims=True)                # (T, 1)  XLU reduce
    d = x - mean
    # torch .std() default is unbiased: divide by (N - 1).
    var = jnp.sum(d * d, axis=-1, keepdims=True) * (1.0 / max(features - 1, 1))
    denom = jnp.sqrt(var) + eps                               # eps added to std
    # Exact reciprocal on the narrow (T, 1) column only (full-tile work stays
    # a multiply); exact keeps f32 parity with the reference.
    inv = 1.0 / denom                                         # (T, 1)
    a = a_ref[...].astype(jnp.float32)                        # (1, F)
    b = b_ref[...].astype(jnp.float32)                        # (1, F)
    # Recompute (x - mean) here instead of reusing `d` so the compiler does
    # not have to keep a full-tile temporary alive across the reduction
    # (one fewer full-tile store stream; sub is cheap VALU work).
    o_ref[...] = (((x - mean) * inv) * a + b).astype(o_ref.dtype)


def _pick_tile_rows(rows, features, itemsize, budget):
    """Pick a row-tile: big enough to amortize per-step overhead, small enough
    for double-buffered VMEM on every TPU generation (incl. v7x's 64 MiB/TC)."""
    # Sublane packing: f32 -> 8 rows/vreg, bf16 -> 16, int8/fp8 -> 32.
    pack = max(8, 32 // max(1, itemsize))
    # Per tile-row footprint: 2x in-buffers + 2x out-buffers (double buffered)
    # plus ~5x f32 compute temporaries (cast copy, centered, squared term,
    # normalized product, affine product can all materialize because the
    # reductions break elementwise fusion).
    per_row = features * (4 * itemsize + 5 * 4)
    tile = max(pack, _round_down(budget // per_row, pack))
    tile = min(tile, 1024)                        # diminishing returns past ~1K rows
    tile = min(tile, _round_up(rows, pack))       # never bigger than the problem
    # Keep >= ~8 grid steps when rows permit: v7x shards the grid over 2 TCs,
    # so that is >= 4 steps per core and the prefetch/writeback pipeline can
    # actually hide DMA.  Rows per tile stay in the hundreds so the ~0.35 us
    # per-step overhead is still amortized.
    if rows >= 8 * pack:
        tile = min(tile, max(pack, _round_up(pl.cdiv(rows, 8), pack)))
    return tile


def layer_norm(x, a_2, b_2, eps=1e-6, tile_rows=None):
    """x: (..., features). a_2, b_2: (features,)."""
    orig_shape = x.shape
    features = orig_shape[-1]
    rows = math.prod(orig_shape[:-1]) if len(orig_shape) > 1 else 1

    x2 = x.reshape(rows, features)
    a2 = a_2.reshape(1, features)
    b2 = b_2.reshape(1, features)

    budget, vmem_limit = _vmem_budget_and_limit()
    if tile_rows is None:
        tile_rows = _pick_tile_rows(rows, features, x.dtype.itemsize, budget)

    # Ragged trailing block: OOB input rows read garbage but every row
    # normalizes independently; OOB output rows are masked on store.
    grid = (pl.cdiv(rows, tile_rows),)

    itemsize = x.dtype.itemsize
    cost = pl.CostEstimate(
        flops=10 * rows * features,
        transcendentals=2 * rows,
        bytes_accessed=2 * rows * features * itemsize + 2 * features * itemsize,
    )

    out = pl.pallas_call(
        functools.partial(_layernorm_kernel, eps=eps, features=features),
        out_shape=jax.ShapeDtypeStruct((rows, features), x.dtype),
        grid_spec=pltpu.PrefetchScalarGridSpec(
            num_scalar_prefetch=0,
            grid=grid,
            in_specs=[
                pl.BlockSpec((tile_rows, features), lambda i: (i, 0)),
                pl.BlockSpec((1, features), lambda i: (0, 0)),
                pl.BlockSpec((1, features), lambda i: (0, 0)),
            ],
            out_specs=pl.BlockSpec((tile_rows, features), lambda i: (i, 0)),
        ),
        compiler_params=pltpu.CompilerParams(
            dimension_semantics=("parallel",),
            vmem_limit_bytes=vmem_limit,
        ),
        cost_estimate=cost,
    )(x2, a2, b2)

    return out.reshape(orig_shape)


def layer_norm_ref(x, a_2, b_2, eps=1e-6):
    """Pure-JAX reference mirroring the PyTorch module."""
    mean = jnp.mean(x, axis=-1, keepdims=True)
    n = x.shape[-1]
    var = jnp.sum((x - mean) ** 2, axis=-1, keepdims=True) / (n - 1)
    std = jnp.sqrt(var)
    return a_2 * (x - mean) / (std + eps) + b_2


if __name__ == "__main__":
    key = jax.random.PRNGKey(0)
    k_x, k_a, k_b, k_x2 = jax.random.split(key, 4)
    batch, seq, hidden = 2, 8, 32

    x = jax.random.normal(k_x, (batch, seq, hidden), dtype=jnp.float32)

    # Module init: nn.Parameter(torch.ones(features)) / torch.zeros(features).
    a_2 = jnp.ones((hidden,), dtype=jnp.float32)
    b_2 = jnp.zeros((hidden,), dtype=jnp.float32)

    y = jax.block_until_ready(layer_norm(x, a_2, b_2))
    y_ref = layer_norm_ref(x, a_2, b_2)
    assert y.shape == x.shape
    assert jnp.allclose(y, y_ref, atol=1e-5, rtol=1e-5), (
        f"max abs err {jnp.max(jnp.abs(y - y_ref))}"
    )

    # Second check with non-trivial affine params (still deterministic).
    a_r = jax.random.normal(k_a, (hidden,), dtype=jnp.float32)
    b_r = jax.random.normal(k_b, (hidden,), dtype=jnp.float32)
    y2 = jax.block_until_ready(layer_norm(x, a_r, b_r))
    y2_ref = layer_norm_ref(x, a_r, b_r)
    assert jnp.allclose(y2, y2_ref, atol=1e-5, rtol=1e-5), (
        f"max abs err {jnp.max(jnp.abs(y2 - y2_ref))}"
    )

    # Third check: rows not divisible by the tile (ragged trailing block path).
    xr = jax.random.normal(k_x2, (3, 5, hidden), dtype=jnp.float32)  # rows = 15
    y3 = jax.block_until_ready(layer_norm(xr, a_r, b_r, tile_rows=8))
    y3_ref = layer_norm_ref(xr, a_r, b_r)
    assert jnp.allclose(y3, y3_ref, atol=1e-5, rtol=1e-5), (
        f"max abs err {jnp.max(jnp.abs(y3 - y3_ref))}"
    )

    print("KERNEL_OK")
</pallas_src>

<mosaic_0001>
module attributes {stable_mosaic.version = 11 : i64} {
  func.func @_layernorm_kernel(%arg0: i32, %arg1: memref<16x32xf32, #tpu.memory_space<vmem>>, %arg2: memref<1x32xf32, #tpu.memory_space<vmem>>, %arg3: memref<1x32xf32, #tpu.memory_space<vmem>>, %arg4: memref<16x32xf32, #tpu.memory_space<vmem>>) attributes {dimension_semantics = [#tpu.dimension_semantics<parallel>], iteration_bounds = array<i64: 1>, scalar_prefetch = 0 : i64, scratch_operands = 0 : i64, tpu.core_type = #tpu.core_type<tc>, window_params = [{transform_indices = @transform_0, window_bounds = array<i64: 16, 32>}, {pipeline_mode = #tpu.pipeline_mode<synchronous>, transform_indices = @transform_1, window_bounds = array<i64: 1, 32>}, {pipeline_mode = #tpu.pipeline_mode<synchronous>, transform_indices = @transform_2, window_bounds = array<i64: 1, 32>}, {transform_indices = @transform_3, window_bounds = array<i64: 16, 32>}]} {
    %c0 = arith.constant 0 : index
    %c0_0 = arith.constant 0 : index
    %0 = vector.load %arg1[%c0, %c0_0] : memref<16x32xf32, #tpu.memory_space<vmem>>, vector<16x32xf32>
    %cst = arith.constant dense<0.000000e+00> : vector<16xf32>
    %1 = vector.multi_reduction <add>, %0, %cst [1] : vector<16x32xf32> to vector<16xf32>
    %2 = vector.shape_cast %1 : vector<16xf32> to vector<16x1xf32>
    %cst_1 = arith.constant 3.200000e+01 : f32
    %3 = vector.broadcast %cst_1 : f32 to vector<16x1xf32>
    %4 = arith.divf %2, %3 : vector<16x1xf32>
    %5 = vector.broadcast %4 : vector<16x1xf32> to vector<16x32xf32>
    %6 = arith.subf %0, %5 : vector<16x32xf32>
    %7 = arith.mulf %6, %6 : vector<16x32xf32>
    %cst_2 = arith.constant dense<0.000000e+00> : vector<16xf32>
    %8 = vector.multi_reduction <add>, %7, %cst_2 [1] : vector<16x32xf32> to vector<16xf32>
    %9 = vector.shape_cast %8 : vector<16xf32> to vector<16x1xf32>
    %cst_3 = arith.constant 0.0322580636 : f32
    %10 = vector.broadcast %cst_3 : f32 to vector<16x1xf32>
    %11 = arith.mulf %9, %10 : vector<16x1xf32>
    %12 = math.sqrt %11 : vector<16x1xf32>
    %cst_4 = arith.constant 9.99999997E-7 : f32
    %13 = vector.broadcast %cst_4 : f32 to vector<16x1xf32>
    %14 = arith.addf %12, %13 : vector<16x1xf32>
    %cst_5 = arith.constant 1.000000e+00 : f32
    %15 = vector.broadcast %cst_5 : f32 to vector<16x1xf32>
    %16 = arith.divf %15, %14 : vector<16x1xf32>
    %c0_6 = arith.constant 0 : index
    %c0_7 = arith.constant 0 : index
    %17 = vector.load %arg2[%c0_6, %c0_7] : memref<1x32xf32, #tpu.memory_space<vmem>>, vector<1x32xf32>
    %c0_8 = arith.constant 0 : index
    %c0_9 = arith.constant 0 : index
    %18 = vector.load %arg3[%c0_8, %c0_9] : memref<1x32xf32, #tpu.memory_space<vmem>>, vector<1x32xf32>
    %19 = vector.broadcast %4 : vector<16x1xf32> to vector<16x32xf32>
    %20 = arith.subf %0, %19 : vector<16x32xf32>
    %21 = vector.broadcast %16 : vector<16x1xf32> to vector<16x32xf32>
    %22 = arith.mulf %20, %21 : vector<16x32xf32>
    %23 = vector.broadcast %17 : vector<1x32xf32> to vector<16x32xf32>
    %24 = arith.mulf %22, %23 : vector<16x32xf32>
    %25 = vector.broadcast %18 : vector<1x32xf32> to vector<16x32xf32>
    %26 = arith.addf %24, %25 : vector<16x32xf32>
    %c0_10 = arith.constant 0 : index
    %c0_11 = arith.constant 0 : index
    %27 = vector.load %arg4[%c0_10, %c0_11] : memref<16x32xf32, #tpu.memory_space<vmem>>, vector<16x32xf32>
    tpu.vector_store %arg4[%c0_10, %c0_11], %26 {strides = array<i32>} : memref<16x32xf32, #tpu.memory_space<vmem>>, vector<16x32xf32>,
    return
  }
  func.func @transform_0(%arg0: i32) -> (i32, i32) {
    %c0_i32 = arith.constant 0 : i32
    %c0_i32_0 = arith.constant 0 : i32
    return %arg0, %c0_i32 : i32, i32
  }
  func.func @transform_1(%arg0: i32) -> (i32, i32) {
    %c0_i32 = arith.constant 0 : i32
    %c0_i32_0 = arith.constant 0 : i32
    %c0_i32_1 = arith.constant 0 : i32
    return %c0_i32, %c0_i32_0 : i32, i32
  }
  func.func @transform_2(%arg0: i32) -> (i32, i32) {
    %c0_i32 = arith.constant 0 : i32
    %c0_i32_0 = arith.constant 0 : i32
    %c0_i32_1 = arith.constant 0 : i32
    return %c0_i32, %c0_i32_0 : i32, i32
  }
  func.func @transform_3(%arg0: i32) -> (i32, i32) {
    %c0_i32 = arith.constant 0 : i32
    %c0_i32_0 = arith.constant 0 : i32
    return %arg0, %c0_i32 : i32, i32
  }
}

</mosaic_0001>

<bundles_post_ra>
// kernel: tpu_custom_call.1
= control target key start
LH: loop header
LB: loop body
LE: loop exit
PB: predicated region body
PF: predicated region fallthrough
CT: control target
= control target key end

     0   :  { %8 = vsyncpa [#allocation3], 0  ;;  %s218_s0 = inlined_call_operand.hbm [shape: f32[16,32], index: 0, kind: input, shape index: {}]   ;;  %s219_s1 = inlined_call_operand.vmem [shape: f32[1,32], index: 1, kind: input, shape index: {}]   ;;  %s220_s2 = inlined_call_operand.vmem [shape: f32[1,32], index: 2, kind: input, shape index: {}]   ;;  %s221_s3 = inlined_call_operand.hbm [shape: f32[16,32], index: 3, kind: output, shape index: {}]  }
   0x1   :  { %9 = vsyncpa [#allocation4], 0  ;;  %s170_s12 = smov [#allocation2]  }
   0x2   :  { %s15_s13 = sshll.u32 %s170_s12, 4  ;;  %s16_s13 = int_to_ptr.vmem [resolvable:$true] %s15_s13 }
   0x3   :  { %s134_s14 = scalar_lea.vmem %s16_s13, 256  ;;  %p139_p1 = scmp.lt.s32.totalorder %s16_s13, %s16_s13 }
   0x4   :  { %p135_p0 = scmp.ne.s32.totalorder %s16_s13, %s134_s14  ;;  %p140_p2 = scmp.lt.s32.totalorder %s134_s14, %s134_s14 }
   0x6   :  { %p141_p3 = por %p140_p2, %p139_p1 }
   0x8   :  { %p142_p4 = pnand %p141_p3, %p135_p0 }
   0xa   :  { %145 = shalt.err (!%p142_p4)
}
   0xb   :  { %s171_s15 = smov 128   ;;  %s172_s16 = smov 8  }
   0xc   :  { %21 = dma.hbm_to_vmem [thread:$0]  %s218_s0, 256, %s16_s13, [#allocation3], %s171_s15, %s171_s15, %s172_s16  }
   0xd   :  { %166 = dma.done.wait [#allocation3], 256  }
   0xe   :  { %167 = vsyncadd [#allocation3], 4294967040  ;;  %vm31_vm0 = vcmask 261120   ;;  %v29_v0 = vld [vmem:[#allocation2] sm:$0xff]  ;;  %v30_v1 = vld [vmem:[#allocation2 + $0x8] sm:$0xff]  ;;  %s173_s22 = smov [#allocation5]  }
   0xf   :  { %v32_v2 = vsel %vm31_vm0, %v29_v0, 0.0  ;;  %v35_v3 = vsel %vm31_vm0, %v30_v1, 0.0  ;;  %v112_v31 = vld [vmem:[%s219_s1] ss:$0 sm:$0xff]  ;;  %s100_s23 = sshll.u32 %s173_s22, 4  ;;  %s101_s23 = int_to_ptr.vmem [resolvable:$true] %s100_s23 }
  0x10   :  { %33 = vadd.xlane.f32.xlu0 %v32_v2  ;;  %v113_v33 = vld [vmem:[%s220_s2] ss:$0 sm:$0xff]  ;;  %s146_s24 = scalar_lea.vmem %s101_s23, 256  ;;  %p151_p6 = scmp.lt.s32.totalorder %s101_s23, %s101_s23 }
  0x11   :  { %p147_p5 = scmp.ne.s32.totalorder %s101_s23, %s146_s24  ;;  %p152_p7 = scmp.lt.s32.totalorder %s146_s24, %s146_s24 }
  0x13   :  { %p153_p8 = por %p152_p7, %p151_p6 }
  0x14   :  { %36 = vadd.xlane.f32.xlu0 %v35_v3 }
  0x15   :  { %p154_p9 = pnand %p153_p8, %p147_p5 }
  0x99   :  { %v34_v4 = vpop.xlane.xlu0 %33 }
  0x9a   :  { %v39_v5 = vmul.f32 0.03125, %v34_v4 }
  0x9c   :  { %v41_v6 = vsub.f32 %v29_v0, %v39_v5 }
  0x9d   :  { %v37_v7 = vpop.xlane.xlu0 %36 }
  0x9e   :  { %v40_v8 = vmul.f32 0.03125, %v37_v7  ;;  %v43_v9 = vmul.f32 %v41_v6, %v41_v6 }
  0xa0   :  { %v42_v10 = vsub.f32 %v30_v1, %v40_v8  ;;  %v45_v11 = vsel %vm31_vm0, %v43_v9, 0.0 }
  0xa1   :  { %46 = vadd.xlane.f32.xlu1 %v45_v11 }
  0xa2   :  { %v44_v12 = vmul.f32 %v42_v10, %v42_v10 }
  0xa4   :  { %v48_v13 = vsel %vm31_vm0, %v44_v12, 0.0 }
  0xa5   :  { %49 = vadd.xlane.f32.xlu1 %v48_v13 }
 0x12a   :  { %v47_v14 = vpop.xlane.xlu1 %46 }
 0x12b   :  { %v51_v15 = vmul.f32 0.032258064, %v47_v14 }
 0x12d   :  { %118 = vrsqrt.f32 %v51_v15  ;;  %vm55_vm1 = vcmp.eq.f32.partialorder %v51_v15, inf  ;;  %v58_v20 = vand.u32 2147483648, %v51_v15  ;;  %vm57_vm2 = vcmp.eq.f32.partialorder %v51_v15, 0.0 }
 0x12e   :  { %v50_v16 = vpop.xlane.xlu1 %49 }
 0x12f   :  { %v52_v17 = vmul.f32 0.032258064, %v50_v16 }
 0x131   :  { %120 = vrsqrt.f32 %v52_v17  ;;  %vm62_vm3 = vcmp.eq.f32.partialorder %v52_v17, inf  ;;  %v65_v26 = vand.u32 2147483648, %v52_v17  ;;  %vm64_vm4 = vcmp.eq.f32.partialorder %v52_v17, 0.0 }
 0x13a   :  { %v119_v18 = vpop.eup %118 }
 0x13b   :  { %v54_v19 = vmul.f32 %v119_v18, %v51_v15 }
 0x13d   :  { %v56_v21 = vsel %vm55_vm1, %v51_v15, %v54_v19 }
 0x13e   :  { %v121_v22 = vpop.eup %120  ;;  %v59_v23 = vsel %vm57_vm2, %v58_v20, %v56_v21 }
 0x13f   :  { %v67_v24 = vadd.f32 1e-06, %v59_v23  ;;  %v61_v25 = vmul.f32 %v121_v22, %v52_v17 }
 0x141   :  { %122 = vrcp.f32 %v67_v24  ;;  %v63_v27 = vsel %vm62_vm3, %v52_v17, %v61_v25 }
 0x142   :  { %v66_v28 = vsel %vm64_vm4, %v65_v26, %v63_v27 }
 0x143   :  { %v68_v29 = vadd.f32 1e-06, %v66_v28 }
 0x145   :  { %124 = vrcp.f32 %v68_v29 }
 0x14e   :  { %v123_v30 = vpop.eup %122 }
 0x14f   :  { %v75_v32 = vmul.f32 %v123_v30, %v41_v6 }
 0x151   :  { %v83_v34 = vmul.f32 %v112_v31, %v75_v32 }
 0x152   :  { %v125_v35 = vpop.eup %124 }
 0x153   :  { %v76_v36 = vmul.f32 %v125_v35, %v42_v10  ;;  %v91_v37 = vadd.f32 %v113_v33, %v83_v34 }
 0x155   :  { %v84_v38 = vmul.f32 %v112_v31, %v76_v36  ;;  %93 = vst.msk [vmem:[#allocation5] sm:$0xff] %vm31_vm0, %v91_v37 }
 0x157   :  { %v92_v39 = vadd.f32 %v113_v33, %v84_v38 }
 0x159   :  { %94 = vst.msk [vmem:[#allocation5 + $0x8] sm:$0xff] %vm31_vm0, %v92_v39 }
 0x15a   :  { %157 = shalt.err (!%p154_p9)
}
 0x15b   :  { %106 = dma.vmem_to_hbm [thread:$0]  %s101_s23, 256, %s221_s3, [#allocation4], %s171_s15, %s171_s15, %s172_s16  }
 0x15c   :  { %168 = dma.done.wait [#allocation4], 256  }
 0x15d   :  { %169 = vsyncadd [#allocation4], 4294967040 }
 0x15e   :  { %110 = vsyncpa [#allocation3], 1 }
 0x15f   :  { %111 = vsyncpa [#allocation4], 1 }

</bundles_post_ra>
